<compile_context>
chip_gen: v7x
topology: tpu7x:2x2x1
jax: 0.10.0
libtpu: 0.0.40
codegen_flags: <defaults>
</compile_context>

<pallas_src>
import functools

import jax
import jax.numpy as jnp
from jax.experimental import pallas as pl
from jax.experimental.pallas import tpu as pltpu


_NEG = -1e30  # finite "minus infinity" for max-pool padding / masking


def _round_up(v, m):
    return (v + m - 1) // m * m


def _pick_pixel_tile(n):
    """Largest lane-friendly tile that divides the pixel count."""
    for t in (2048, 1024, 512, 256, 128):
        if n % t == 0:
            return t
    return n


def _silu(y):
    return y * (1.0 / (1.0 + jnp.exp(-y)))


# ---------------------------------------------------------------------------
# in-kernel building blocks (operate on (C, N) values, channels-first flat)
# ---------------------------------------------------------------------------
def _conv1x1(x, w, b):
    """1x1 conv + folded-BN bias + SiLU: (Cout,Cin)@(Cin,N) on the MXU."""
    return _silu(jnp.dot(w, x, preferred_element_type=jnp.float32) + b)


def _conv3x3(x, w_taps, b, cmask, scr, *, W, off):
    """3x3 stride-1 'same' conv + bias + SiLU on a flat (Cin, N) tile.

    w_taps: (9*Cout, Cin) tap-major.  cmask: (2, N) 0/1 column-validity.
    scr: (Cin, N + 2*off) VMEM scratch, off >= W + 1 (zero halo built here).
    """
    _, N = x.shape
    Cout = b.shape[0]
    scr[...] = jnp.zeros_like(scr)          # zero halo == conv 'same' padding
    scr[:, off:off + N] = x                 # 128-aligned interior store
    xp = scr[...]
    acc = None
    for dy in (-1, 0, 1):
        for dx in (-1, 0, 1):
            t = (dy + 1) * 3 + (dx + 1)
            s = off + dy * W + dx
            xs = xp[:, s:s + N]
            if dx == -1:
                xs = xs * cmask[0:1, :]
            elif dx == 1:
                xs = xs * cmask[1:2, :]
            part = jnp.dot(w_taps[t * Cout:(t + 1) * Cout, :], xs,
                           preferred_element_type=jnp.float32)
            acc = part if acc is None else acc + part
    return _silu(acc + b)


def _maxpool5(x, pmask, scr, *, W, off):
    """5x5 stride-1 'same' max pool on a flat (C, N) tile.

    pmask: (5, N) additive mask (0 valid / _NEG invalid), row = dx + 2.
    scr: (C, N + 2*off) VMEM scratch whose halo already holds _NEG.
    """
    _, N = x.shape
    scr[:, off:off + N] = x
    xp = scr[...]
    out = None
    for dy in range(-2, 3):
        for dx in range(-2, 3):
            s = off + dy * W + dx
            xs = xp[:, s:s + N]
            if dx != 0:
                xs = xs + pmask[dx + 2:dx + 3, :]
            out = xs if out is None else jnp.maximum(out, xs)
    return out


# ---------------------------------------------------------------------------
# Kernel A: cv1 (1x1) -> cv3 (3x3) -> cv4 (1x1), one image per grid step
# ---------------------------------------------------------------------------
def _cv134_kernel(x_ref, w1_ref, b1_ref, w3_ref, b3_ref, w4_ref, b4_ref,
                  cmask_ref, o_ref, scr, *, W, off):
    cmask = cmask_ref[...]
    t1 = _conv1x1(x_ref[...], w1_ref[...], b1_ref[...])
    t3 = _conv3x3(t1, w3_ref[...], b3_ref[...], cmask, scr, W=W, off=off)
    o_ref[...] = _conv1x1(t3, w4_ref[...], b4_ref[...]).astype(o_ref.dtype)


def _fused_cv134(xf, f1, f3, f4, cmask, H, W):
    B, c1, N = xf.shape
    w1, b1 = f1
    w3, b3 = f3
    w4, b4 = f4
    c_ = b1.shape[0]
    off = _round_up(W + 1, 128)
    cost = pl.CostEstimate(
        flops=int(2 * B * N * (c1 * c_ + 9 * c_ * c_ + c_ * c_)),
        transcendentals=int(3 * B * N * c_),
        bytes_accessed=int(4 * (B * N * (c1 + c_) + c1 * c_ + 10 * c_ * c_ + 3 * c_)),
    )
    return pl.pallas_call(
        functools.partial(_cv134_kernel, W=W, off=off),
        out_shape=jax.ShapeDtypeStruct((B, c_, N), jnp.float32),
        grid=(B,),
        in_specs=[
            pl.BlockSpec((None, c1, N), lambda b: (b, 0, 0)),
            pl.BlockSpec(w1.shape, lambda b: (0, 0)),
            pl.BlockSpec(b1.shape, lambda b: (0, 0)),
            pl.BlockSpec(w3.shape, lambda b: (0, 0)),
            pl.BlockSpec(b3.shape, lambda b: (0, 0)),
            pl.BlockSpec(w4.shape, lambda b: (0, 0)),
            pl.BlockSpec(b4.shape, lambda b: (0, 0)),
            pl.BlockSpec(cmask.shape, lambda b: (0, 0)),
        ],
        out_specs=pl.BlockSpec((None, c_, N), lambda b: (b, 0, 0)),
        scratch_shapes=[pltpu.VMEM((c_, N + 2 * off), jnp.float32)],
        compiler_params=pltpu.CompilerParams(dimension_semantics=("parallel",)),
        cost_estimate=cost,
    )(xf, w1, b1, w3, b3, w4, b4, cmask)


# ---------------------------------------------------------------------------
# Kernel B: SPP(5,9,13) (chained 5x5 pools) -> cv5 (1x1) -> cv6 (3x3)
# ---------------------------------------------------------------------------
def _spp_cv56_kernel(x1_ref, w5a_ref, w5b_ref, w5c_ref, w5d_ref, b5_ref,
                     w6_ref, b6_ref, cmask_ref, pmask_ref, o_ref, scr,
                     *, W, off):
    cmask = cmask_ref[...]
    pmask = pmask_ref[...]
    x1 = x1_ref[...]

    # SPPF identity: maxpool9 = pool5(pool5), maxpool13 = pool5(pool5(pool5)).
    scr[...] = jnp.full_like(scr, _NEG)      # halo stays _NEG across the chain
    p1 = _maxpool5(x1, pmask, scr, W=W, off=off)
    p2 = _maxpool5(p1, pmask, scr, W=W, off=off)
    p3 = _maxpool5(p2, pmask, scr, W=W, off=off)

    # cv5 on the (never materialized) channel concat [x1, p1, p2, p3].
    acc = jnp.dot(w5a_ref[...], x1, preferred_element_type=jnp.float32)
    acc = acc + jnp.dot(w5b_ref[...], p1, preferred_element_type=jnp.float32)
    acc = acc + jnp.dot(w5c_ref[...], p2, preferred_element_type=jnp.float32)
    acc = acc + jnp.dot(w5d_ref[...], p3, preferred_element_type=jnp.float32)
    t5 = _silu(acc + b5_ref[...])

    y1 = _conv3x3(t5, w6_ref[...], b6_ref[...], cmask, scr, W=W, off=off)
    o_ref[...] = y1.astype(o_ref.dtype)


def _fused_spp_cv56(x1, f5, f6, cmask, pmask, H, W):
    B, c_, N = x1.shape
    w5, b5 = f5
    w6, b6 = f6
    # Split cv5 weight to match the virtual concat [x1, pool5, pool9, pool13].
    w5a, w5b, w5c, w5d = (w5[:, i * c_:(i + 1) * c_] for i in range(4))
    off = _round_up(2 * W + 2, 128)          # halo for the 5x5 pool (r = 2)
    cost = pl.CostEstimate(
        flops=int(2 * B * N * (4 * c_ * c_ + 9 * c_ * c_)),
        transcendentals=int(2 * B * N * c_),
        bytes_accessed=int(4 * (2 * B * N * c_ + 13 * c_ * c_ + 2 * c_)),
    )
    return pl.pallas_call(
        functools.partial(_spp_cv56_kernel, W=W, off=off),
        out_shape=jax.ShapeDtypeStruct((B, c_, N), jnp.float32),
        grid=(B,),
        in_specs=[
            pl.BlockSpec((None, c_, N), lambda b: (b, 0, 0)),
            pl.BlockSpec((c_, c_), lambda b: (0, 0)),
            pl.BlockSpec((c_, c_), lambda b: (0, 0)),
            pl.BlockSpec((c_, c_), lambda b: (0, 0)),
            pl.BlockSpec((c_, c_), lambda b: (0, 0)),
            pl.BlockSpec(b5.shape, lambda b: (0, 0)),
            pl.BlockSpec(w6.shape, lambda b: (0, 0)),
            pl.BlockSpec(b6.shape, lambda b: (0, 0)),
            pl.BlockSpec(cmask.shape, lambda b: (0, 0)),
            pl.BlockSpec(pmask.shape, lambda b: (0, 0)),
        ],
        out_specs=pl.BlockSpec((None, c_, N), lambda b: (b, 0, 0)),
        scratch_shapes=[pltpu.VMEM((c_, N + 2 * off), jnp.float32)],
        compiler_params=pltpu.CompilerParams(dimension_semantics=("parallel",)),
        cost_estimate=cost,
    )(x1, w5a, w5b, w5c, w5d, b5, w6, b6, cmask, pmask)


# ---------------------------------------------------------------------------
# Kernel C: cv2 (1x1 on x) + cv7 (1x1 on virtual cat(y1, y2)), pixel-tiled
# ---------------------------------------------------------------------------
def _cv27_kernel(x_ref, y1_ref, w2_ref, b2_ref, w7a_ref, w7b_ref, b7_ref, o_ref):
    y2 = _conv1x1(x_ref[...], w2_ref[...], b2_ref[...])
    acc = jnp.dot(w7a_ref[...], y1_ref[...], preferred_element_type=jnp.float32)
    acc = acc + jnp.dot(w7b_ref[...], y2, preferred_element_type=jnp.float32)
    o_ref[...] = _silu(acc + b7_ref[...]).astype(o_ref.dtype)


def _fused_cv27(xf, y1, f2, f7):
    B, c1, N = xf.shape
    c_ = y1.shape[1]
    w2, b2 = f2
    w7, b7 = f7
    c2 = b7.shape[0]
    w7a, w7b = w7[:, :c_], w7[:, c_:]
    TN = _pick_pixel_tile(N)
    cost = pl.CostEstimate(
        flops=int(2 * B * N * (c1 * c_ + 2 * c_ * c2)),
        transcendentals=int(B * N * (c_ + c2)),
        bytes_accessed=int(4 * (B * N * (c1 + c_ + c2)
                                + c1 * c_ + 2 * c_ * c2 + c_ + c2)),
    )
    return pl.pallas_call(
        _cv27_kernel,
        out_shape=jax.ShapeDtypeStruct((B, c2, N), jnp.float32),
        grid=(B, N // TN),
        in_specs=[
            pl.BlockSpec((None, c1, TN), lambda b, t: (b, 0, t)),
            pl.BlockSpec((None, c_, TN), lambda b, t: (b, 0, t)),
            pl.BlockSpec(w2.shape, lambda b, t: (0, 0)),
            pl.BlockSpec(b2.shape, lambda b, t: (0, 0)),
            pl.BlockSpec(w7a.shape, lambda b, t: (0, 0)),
            pl.BlockSpec(w7b.shape, lambda b, t: (0, 0)),
            pl.BlockSpec(b7.shape, lambda b, t: (0, 0)),
        ],
        out_specs=pl.BlockSpec((None, c2, TN), lambda b, t: (b, 0, t)),
        compiler_params=pltpu.CompilerParams(
            dimension_semantics=("parallel", "parallel")),
        cost_estimate=cost,
    )(xf, y1, w2, b2, w7a, w7b, b7)


# ---------------------------------------------------------------------------
# parameter folding + full SPPCSPC forward
# ---------------------------------------------------------------------------
def _fold_bn(p, eps=1e-5):
    """Fold eval-mode BatchNorm into the bias-free conv weight.

    Returns (folded weight, bias(Cout, 1)): 1x1 -> (Cout, Cin); 3x3 -> the
    tap-major (9*Cout, Cin) layout used by the 3x3 block.
    """
    w = p["w"]                                    # (Cout, Cin, k, k)
    s = p["gamma"] / jnp.sqrt(p["var"] + eps)     # (Cout,)
    b = (p["beta"] - p["mean"] * s).reshape(-1, 1)
    Cout, Cin, k, _ = w.shape
    wf = w * s[:, None, None, None]
    if k == 1:
        return wf[:, :, 0, 0], b
    # rows [t*Cout:(t+1)*Cout] correspond to tap t = (dy+1)*3 + (dx+1)
    return jnp.transpose(wf, (2, 3, 0, 1)).reshape(k * k * Cout, Cin), b


def sppcspc_forward(x, params, eps=1e-5):
    """SPPCSPC forward (eval-mode BN). x: (B, c1, H, W) -> (B, c2, H, W)."""
    B, c1, H, W = x.shape
    N = H * W
    xf = x.reshape(B, c1, N)                      # channels-first flat (free)

    f = {name: _fold_bn(p, eps) for name, p in params.items()}

    # Tiny precomputed column-validity masks (constant index map, fetched once).
    col = jnp.arange(N, dtype=jnp.int32) % W
    cmask = jnp.stack([
        (col >= 1).astype(jnp.float32),           # conv dx = -1 valid
        (col <= W - 2).astype(jnp.float32),       # conv dx = +1 valid
    ])                                            # (2, N), multiplicative
    pmask = jnp.stack([
        jnp.where((col + d >= 0) & (col + d < W), 0.0, _NEG)
        for d in range(-2, 3)
    ]).astype(jnp.float32)                        # (5, N), additive

    x1 = _fused_cv134(xf, f["cv1"], f["cv3"], f["cv4"], cmask, H, W)
    y1 = _fused_spp_cv56(x1, f["cv5"], f["cv6"], cmask, pmask, H, W)
    out = _fused_cv27(xf, y1, f["cv2"], f["cv7"])
    return out.reshape(B, -1, H, W)


# ---------------------------------------------------------------------------
# pure-JAX reference (eval-mode BN) for validation
# ---------------------------------------------------------------------------
def _conv_bn_silu_ref(x, p, eps=1e-5):
    w = p["w"]
    k = w.shape[-1]
    pad = k // 2
    y = jax.lax.conv_general_dilated(
        x, w, window_strides=(1, 1), padding=[(pad, pad), (pad, pad)],
        dimension_numbers=("NCHW", "OIHW", "NCHW"),
        precision=jax.lax.Precision.HIGHEST)
    s = p["gamma"] / jnp.sqrt(p["var"] + eps)
    b = p["beta"] - p["mean"] * s
    y = y * s[None, :, None, None] + b[None, :, None, None]
    return y * jax.nn.sigmoid(y)


def _maxpool_ref(x, k):
    pad = k // 2
    return jax.lax.reduce_window(
        x, -jnp.inf, jax.lax.max, (1, 1, k, k), (1, 1, 1, 1),
        [(0, 0), (0, 0), (pad, pad), (pad, pad)])


def sppcspc_ref(x, params, eps=1e-5):
    cbs = lambda name, inp: _conv_bn_silu_ref(inp, params[name], eps)
    x1 = cbs("cv4", cbs("cv3", cbs("cv1", x)))
    cat1 = jnp.concatenate([x1] + [_maxpool_ref(x1, k) for k in (5, 9, 13)], axis=1)
    y1 = cbs("cv6", cbs("cv5", cat1))
    y2 = cbs("cv2", x)
    return cbs("cv7", jnp.concatenate([y1, y2], axis=1))


if __name__ == "__main__":
    B, c1, c2, H, W = 2, 8, 8, 16, 16
    e = 0.5
    c_ = int(2 * c2 * e)          # hidden width (== c2 for e = 0.5)

    def make_conv(key, cout, cin, k):
        kw, kg, kb, km, kv = jax.random.split(key, 5)
        return dict(
            w=(0.5 / (cin * k * k) ** 0.5)
              * jax.random.normal(kw, (cout, cin, k, k), dtype=jnp.float32),
            gamma=1.0 + 0.1 * jax.random.normal(kg, (cout,), dtype=jnp.float32),
            beta=0.1 * jax.random.normal(kb, (cout,), dtype=jnp.float32),
            mean=0.1 * jax.random.normal(km, (cout,), dtype=jnp.float32),
            var=1.0 + 0.2 * jax.random.uniform(kv, (cout,), dtype=jnp.float32),
        )

    keys = jax.random.split(jax.random.PRNGKey(0), 8)
    params = {
        "cv1": make_conv(keys[0], c_, c1, 1),
        "cv2": make_conv(keys[1], c_, c1, 1),
        "cv3": make_conv(keys[2], c_, c_, 3),
        "cv4": make_conv(keys[3], c_, c_, 1),
        "cv5": make_conv(keys[4], c_, 4 * c_, 1),
        "cv6": make_conv(keys[5], c_, c_, 3),
        "cv7": make_conv(keys[6], c2, 2 * c_, 1),
    }
    x = jax.random.normal(keys[7], (B, c1, H, W), dtype=jnp.float32)

    out = jax.block_until_ready(sppcspc_forward(x, params))
    ref = sppcspc_ref(x, params)

    assert out.shape == (B, c2, H, W), out.shape
    max_err = float(jnp.max(jnp.abs(out - ref)))
    assert jnp.allclose(out, ref, rtol=1e-3, atol=1e-3), f"max abs err = {max_err}"
    print("KERNEL_OK")
</pallas_src>

<mosaic_0001>
module attributes {stable_mosaic.version = 11 : i64} {
  func.func @_cv134_kernel(%arg0: i32, %arg1: memref<1x8x256xf32, #tpu.memory_space<vmem>>, %arg2: memref<8x8xf32, #tpu.memory_space<vmem>>, %arg3: memref<8x1xf32, #tpu.memory_space<vmem>>, %arg4: memref<72x8xf32, #tpu.memory_space<vmem>>, %arg5: memref<8x1xf32, #tpu.memory_space<vmem>>, %arg6: memref<8x8xf32, #tpu.memory_space<vmem>>, %arg7: memref<8x1xf32, #tpu.memory_space<vmem>>, %arg8: memref<2x256xf32, #tpu.memory_space<vmem>>, %arg9: memref<1x8x256xf32, #tpu.memory_space<vmem>>, %arg10: memref<8x512xf32, #tpu.memory_space<vmem>>) attributes {dimension_semantics = [#tpu.dimension_semantics<parallel>], iteration_bounds = array<i64: 2>, scalar_prefetch = 0 : i64, scratch_operands = 1 : i64, tpu.core_type = #tpu.core_type<tc>, window_params = [{transform_indices = @transform_0, window_bounds = array<i64: 1, 8, 256>}, {pipeline_mode = #tpu.pipeline_mode<synchronous>, transform_indices = @transform_1, window_bounds = array<i64: 8, 8>}, {pipeline_mode = #tpu.pipeline_mode<synchronous>, transform_indices = @transform_2, window_bounds = array<i64: 8, 1>}, {pipeline_mode = #tpu.pipeline_mode<synchronous>, transform_indices = @transform_3, window_bounds = array<i64: 72, 8>}, {pipeline_mode = #tpu.pipeline_mode<synchronous>, transform_indices = @transform_4, window_bounds = array<i64: 8, 1>}, {pipeline_mode = #tpu.pipeline_mode<synchronous>, transform_indices = @transform_5, window_bounds = array<i64: 8, 8>}, {pipeline_mode = #tpu.pipeline_mode<synchronous>, transform_indices = @transform_6, window_bounds = array<i64: 8, 1>}, {pipeline_mode = #tpu.pipeline_mode<synchronous>, transform_indices = @transform_7, window_bounds = array<i64: 2, 256>}, {transform_indices = @transform_8, window_bounds = array<i64: 1, 8, 256>}]} {
    %c0 = arith.constant 0 : index
    %c0_0 = arith.constant 0 : index
    %0 = vector.load %arg8[%c0, %c0_0] : memref<2x256xf32, #tpu.memory_space<vmem>>, vector<2x256xf32>
    %c0_1 = arith.constant 0 : index
    %c0_2 = arith.constant 0 : index
    %c0_3 = arith.constant 0 : index
    %1 = vector.load %arg1[%c0_1, %c0_2, %c0_3] : memref<1x8x256xf32, #tpu.memory_space<vmem>>, vector<1x8x256xf32>
    %2 = vector.shape_cast %1 : vector<1x8x256xf32> to vector<8x256xf32>
    %c0_4 = arith.constant 0 : index
    %c0_5 = arith.constant 0 : index
    %3 = vector.load %arg2[%c0_4, %c0_5] : memref<8x8xf32, #tpu.memory_space<vmem>>, vector<8x8xf32>
    %c0_6 = arith.constant 0 : index
    %c0_7 = arith.constant 0 : index
    %4 = vector.load %arg3[%c0_6, %c0_7] : memref<8x1xf32, #tpu.memory_space<vmem>>, vector<8x1xf32>
    %cst = arith.constant dense<0.000000e+00> : vector<8x256xf32>
    %5 = tpu.matmul %3, %2, %cst {dimension_numbers = #tpu.dot_dimension_numbers<[1], [0], [0], [1], [0, 0, 1, 1], [], []>} : vector<8x8xf32>, vector<8x256xf32>, vector<8x256xf32> -> vector<8x256xf32>
    %6 = vector.broadcast %4 : vector<8x1xf32> to vector<8x256xf32>
    %7 = arith.addf %5, %6 : vector<8x256xf32>
    %cst_8 = arith.constant 0.000000e+00 : f32
    %8 = vector.broadcast %cst_8 : f32 to vector<8x256xf32>
    %9 = arith.subf %8, %7 : vector<8x256xf32>
    %10 = math.exp %9 : vector<8x256xf32>
    %cst_9 = arith.constant 1.000000e+00 : f32
    %11 = vector.broadcast %cst_9 : f32 to vector<8x256xf32>
    %12 = arith.addf %11, %10 : vector<8x256xf32>
    %cst_10 = arith.constant 1.000000e+00 : f32
    %13 = vector.broadcast %cst_10 : f32 to vector<8x256xf32>
    %14 = arith.divf %13, %12 : vector<8x256xf32>
    %15 = arith.mulf %7, %14 : vector<8x256xf32>
    %c0_11 = arith.constant 0 : index
    %c0_12 = arith.constant 0 : index
    %16 = vector.load %arg4[%c0_11, %c0_12] : memref<72x8xf32, #tpu.memory_space<vmem>>, vector<72x8xf32>
    %c0_13 = arith.constant 0 : index
    %c0_14 = arith.constant 0 : index
    %17 = vector.load %arg5[%c0_13, %c0_14] : memref<8x1xf32, #tpu.memory_space<vmem>>, vector<8x1xf32>
    %cst_15 = arith.constant 0.000000e+00 : f32
    %18 = vector.broadcast %cst_15 : f32 to vector<8x512xf32>
    %c0_16 = arith.constant 0 : index
    %c0_17 = arith.constant 0 : index
    %19 = vector.load %arg10[%c0_16, %c0_17] : memref<8x512xf32, #tpu.memory_space<vmem>>, vector<8x512xf32>
    tpu.vector_store %arg10[%c0_16, %c0_17], %18 {strides = array<i32>} : memref<8x512xf32, #tpu.memory_space<vmem>>, vector<8x512xf32>,
    %c0_18 = arith.constant 0 : index
    %c128 = arith.constant 128 : index
    %20 = vector.load %arg10[%c0_18, %c128] : memref<8x512xf32, #tpu.memory_space<vmem>>, vector<8x256xf32>
    tpu.vector_store %arg10[%c0_18, %c128], %15 {strides = array<i32>} : memref<8x512xf32, #tpu.memory_space<vmem>>, vector<8x256xf32>,
    %c0_19 = arith.constant 0 : index
    %c0_20 = arith.constant 0 : index
    %21 = vector.load %arg10[%c0_19, %c0_20] : memref<8x512xf32, #tpu.memory_space<vmem>>, vector<8x512xf32>
    %22 = vector.extract_strided_slice %21 {offsets = [0, 111], sizes = [8, 256], strides = [1, 1]} : vector<8x512xf32> to vector<8x256xf32>
    %23 = vector.extract_strided_slice %0 {offsets = [0, 0], sizes = [1, 256], strides = [1, 1]} : vector<2x256xf32> to vector<1x256xf32>
    %24 = vector.broadcast %23 : vector<1x256xf32> to vector<8x256xf32>
    %25 = arith.mulf %22, %24 : vector<8x256xf32>
    %26 = vector.extract_strided_slice %16 {offsets = [0, 0], sizes = [8, 8], strides = [1, 1]} : vector<72x8xf32> to vector<8x8xf32>
    %cst_21 = arith.constant dense<0.000000e+00> : vector<8x256xf32>
    %27 = tpu.matmul %26, %25, %cst_21 {dimension_numbers = #tpu.dot_dimension_numbers<[1], [0], [0], [1], [0, 0, 1, 1], [], []>} : vector<8x8xf32>, vector<8x256xf32>, vector<8x256xf32> -> vector<8x256xf32>
    %28 = vector.extract_strided_slice %21 {offsets = [0, 112], sizes = [8, 256], strides = [1, 1]} : vector<8x512xf32> to vector<8x256xf32>
    %29 = vector.extract_strided_slice %16 {offsets = [8, 0], sizes = [8, 8], strides = [1, 1]} : vector<72x8xf32> to vector<8x8xf32>
    %cst_22 = arith.constant dense<0.000000e+00> : vector<8x256xf32>
    %30 = tpu.matmul %29, %28, %cst_22 {dimension_numbers = #tpu.dot_dimension_numbers<[1], [0], [0], [1], [0, 0, 1, 1], [], []>} : vector<8x8xf32>, vector<8x256xf32>, vector<8x256xf32> -> vector<8x256xf32>
    %31 = arith.addf %27, %30 : vector<8x256xf32>
    %32 = vector.extract_strided_slice %21 {offsets = [0, 113], sizes = [8, 256], strides = [1, 1]} : vector<8x512xf32> to vector<8x256xf32>
    %33 = vector.extract_strided_slice %0 {offsets = [1, 0], sizes = [1, 256], strides = [1, 1]} : vector<2x256xf32> to vector<1x256xf32>
    %34 = vector.broadcast %33 : vector<1x256xf32> to vector<8x256xf32>
    %35 = arith.mulf %32, %34 : vector<8x256xf32>
    %36 = vector.extract_strided_slice %16 {offsets = [16, 0], sizes = [8, 8], strides = [1, 1]} : vector<72x8xf32> to vector<8x8xf32>
    %cst_23 = arith.constant dense<0.000000e+00> : vector<8x256xf32>
    %37 = tpu.matmul %36, %35, %cst_23 {dimension_numbers = #tpu.dot_dimension_numbers<[1], [0], [0], [1], [0, 0, 1, 1], [], []>} : vector<8x8xf32>, vector<8x256xf32>, vector<8x256xf32> -> vector<8x256xf32>
    %38 = arith.addf %31, %37 : vector<8x256xf32>
    %39 = vector.extract_strided_slice %21 {offsets = [0, 127], sizes = [8, 256], strides = [1, 1]} : vector<8x512xf32> to vector<8x256xf32>
    %40 = vector.extract_strided_slice %0 {offsets = [0, 0], sizes = [1, 256], strides = [1, 1]} : vector<2x256xf32> to vector<1x256xf32>
    %41 = vector.broadcast %40 : vector<1x256xf32> to vector<8x256xf32>
    %42 = arith.mulf %39, %41 : vector<8x256xf32>
    %43 = vector.extract_strided_slice %16 {offsets = [24, 0], sizes = [8, 8], strides = [1, 1]} : vector<72x8xf32> to vector<8x8xf32>
    %cst_24 = arith.constant dense<0.000000e+00> : vector<8x256xf32>
    %44 = tpu.matmul %43, %42, %cst_24 {dimension_numbers = #tpu.dot_dimension_numbers<[1], [0], [0], [1], [0, 0, 1, 1], [], []>} : vector<8x8xf32>, vector<8x256xf32>, vector<8x256xf32> -> vector<8x256xf32>
    %45 = arith.addf %38, %44 : vector<8x256xf32>
    %46 = vector.extract_strided_slice %21 {offsets = [0, 128], sizes = [8, 256], strides = [1, 1]} : vector<8x512xf32> to vector<8x256xf32>
    %47 = vector.extract_strided_slice %16 {offsets = [32, 0], sizes = [8, 8], strides = [1, 1]} : vector<72x8xf32> to vector<8x8xf32>
    %cst_25 = arith.constant dense<0.000000e+00> : vector<8x256xf32>
    %48 = tpu.matmul %47, %46, %cst_25 {dimension_numbers = #tpu.dot_dimension_numbers<[1], [0], [0], [1], [0, 0, 1, 1], [], []>} : vector<8x8xf32>, vector<8x256xf32>, vector<8x256xf32> -> vector<8x256xf32>
    %49 = arith.addf %45, %48 : vector<8x256xf32>
    %50 = vector.extract_strided_slice %21 {offsets = [0, 129], sizes = [8, 256], strides = [1, 1]} : vector<8x512xf32> to vector<8x256xf32>
    %51 = vector.extract_strided_slice %0 {offsets = [1, 0], sizes = [1, 256], strides = [1, 1]} : vector<2x256xf32> to vector<1x256xf32>
    %52 = vector.broadcast %51 : vector<1x256xf32> to vector<8x256xf32>
    %53 = arith.mulf %50, %52 : vector<8x256xf32>
    %54 = vector.extract_strided_slice %16 {offsets = [40, 0], sizes = [8, 8], strides = [1, 1]} : vector<72x8xf32> to vector<8x8xf32>
    %cst_26 = arith.constant dense<0.000000e+00> : vector<8x256xf32>
    %55 = tpu.matmul %54, %53, %cst_26 {dimension_numbers = #tpu.dot_dimension_numbers<[1], [0], [0], [1], [0, 0, 1, 1], [], []>} : vector<8x8xf32>, vector<8x256xf32>, vector<8x256xf32> -> vector<8x256xf32>
    %56 = arith.addf %49, %55 : vector<8x256xf32>
    %57 = vector.extract_strided_slice %21 {offsets = [0, 143], sizes = [8, 256], strides = [1, 1]} : vector<8x512xf32> to vector<8x256xf32>
    %58 = vector.extract_strided_slice %0 {offsets = [0, 0], sizes = [1, 256], strides = [1, 1]} : vector<2x256xf32> to vector<1x256xf32>
    %59 = vector.broadcast %58 : vector<1x256xf32> to vector<8x256xf32>
    %60 = arith.mulf %57, %59 : vector<8x256xf32>
    %61 = vector.extract_strided_slice %16 {offsets = [48, 0], sizes = [8, 8], strides = [1, 1]} : vector<72x8xf32> to vector<8x8xf32>
    %cst_27 = arith.constant dense<0.000000e+00> : vector<8x256xf32>
    %62 = tpu.matmul %61, %60, %cst_27 {dimension_numbers = #tpu.dot_dimension_numbers<[1], [0], [0], [1], [0, 0, 1, 1], [], []>} : vector<8x8xf32>, vector<8x256xf32>, vector<8x256xf32> -> vector<8x256xf32>
    %63 = arith.addf %56, %62 : vector<8x256xf32>
    %64 = vector.extract_strided_slice %21 {offsets = [0, 144], sizes = [8, 256], strides = [1, 1]} : vector<8x512xf32> to vector<8x256xf32>
    %65 = vector.extract_strided_slice %16 {offsets = [56, 0], sizes = [8, 8], strides = [1, 1]} : vector<72x8xf32> to vector<8x8xf32>
    %cst_28 = arith.constant dense<0.000000e+00> : vector<8x256xf32>
    %66 = tpu.matmul %65, %64, %cst_28 {dimension_numbers = #tpu.dot_dimension_numbers<[1], [0], [0], [1], [0, 0, 1, 1], [], []>} : vector<8x8xf32>, vector<8x256xf32>, vector<8x256xf32> -> vector<8x256xf32>
    %67 = arith.addf %63, %66 : vector<8x256xf32>
    %68 = vector.extract_strided_slice %21 {offsets = [0, 145], sizes = [8, 256], strides = [1, 1]} : vector<8x512xf32> to vector<8x256xf32>
    %69 = vector.extract_strided_slice %0 {offsets = [1, 0], sizes = [1, 256], strides = [1, 1]} : vector<2x256xf32> to vector<1x256xf32>
    %70 = vector.broadcast %69 : vector<1x256xf32> to vector<8x256xf32>
    %71 = arith.mulf %68, %70 : vector<8x256xf32>
    %72 = vector.extract_strided_slice %16 {offsets = [64, 0], sizes = [8, 8], strides = [1, 1]} : vector<72x8xf32> to vector<8x8xf32>
    %cst_29 = arith.constant dense<0.000000e+00> : vector<8x256xf32>
    %73 = tpu.matmul %72, %71, %cst_29 {dimension_numbers = #tpu.dot_dimension_numbers<[1], [0], [0], [1], [0, 0, 1, 1], [], []>} : vector<8x8xf32>, vector<8x256xf32>, vector<8x256xf32> -> vector<8x256xf32>
    %74 = arith.addf %67, %73 : vector<8x256xf32>
    %75 = vector.broadcast %17 : vector<8x1xf32> to vector<8x256xf32>
    %76 = arith.addf %74, %75 : vector<8x256xf32>
    %cst_30 = arith.constant 0.000000e+00 : f32
    %77 = vector.broadcast %cst_30 : f32 to vector<8x256xf32>
    %78 = arith.subf %77, %76 : vector<8x256xf32>
    %79 = math.exp %78 : vector<8x256xf32>
    %cst_31 = arith.constant 1.000000e+00 : f32
    %80 = vector.broadcast %cst_31 : f32 to vector<8x256xf32>
    %81 = arith.addf %80, %79 : vector<8x256xf32>
    %cst_32 = arith.constant 1.000000e+00 : f32
    %82 = vector.broadcast %cst_32 : f32 to vector<8x256xf32>
    %83 = arith.divf %82, %81 : vector<8x256xf32>
    %84 = arith.mulf %76, %83 : vector<8x256xf32>
    %c0_33 = arith.constant 0 : index
    %c0_34 = arith.constant 0 : index
    %85 = vector.load %arg6[%c0_33, %c0_34] : memref<8x8xf32, #tpu.memory_space<vmem>>, vector<8x8xf32>
    %c0_35 = arith.constant 0 : index
    %c0_36 = arith.constant 0 : index
    %86 = vector.load %arg7[%c0_35, %c0_36] : memref<8x1xf32, #tpu.memory_space<vmem>>, vector<8x1xf32>
    %cst_37 = arith.constant dense<0.000000e+00> : vector<8x256xf32>
    %87 = tpu.matmul %85, %84, %cst_37 {dimension_numbers = #tpu.dot_dimension_numbers<[1], [0], [0], [1], [0, 0, 1, 1], [], []>} : vector<8x8xf32>, vector<8x256xf32>, vector<8x256xf32> -> vector<8x256xf32>
    %88 = vector.broadcast %86 : vector<8x1xf32> to vector<8x256xf32>
    %89 = arith.addf %87, %88 : vector<8x256xf32>
    %cst_38 = arith.constant 0.000000e+00 : f32
    %90 = vector.broadcast %cst_38 : f32 to vector<8x256xf32>
    %91 = arith.subf %90, %89 : vector<8x256xf32>
    %92 = math.exp %91 : vector<8x256xf32>
    %cst_39 = arith.constant 1.000000e+00 : f32
    %93 = vector.broadcast %cst_39 : f32 to vector<8x256xf32>
    %94 = arith.addf %93, %92 : vector<8x256xf32>
    %cst_40 = arith.constant 1.000000e+00 : f32
    %95 = vector.broadcast %cst_40 : f32 to vector<8x256xf32>
    %96 = arith.divf %95, %94 : vector<8x256xf32>
    %97 = arith.mulf %89, %96 : vector<8x256xf32>
    %c0_41 = arith.constant 0 : index
    %c0_42 = arith.constant 0 : index
    %c0_43 = arith.constant 0 : index
    %98 = vector.load %arg9[%c0_41, %c0_42, %c0_43] : memref<1x8x256xf32, #tpu.memory_space<vmem>>, vector<1x8x256xf32>
    %99 = vector.shape_cast %98 : vector<1x8x256xf32> to vector<8x256xf32>
    %100 = vector.shape_cast %97 : vector<8x256xf32> to vector<1x8x256xf32>
    tpu.vector_store %arg9[%c0_41, %c0_42, %c0_43], %100 {strides = array<i32>} : memref<1x8x256xf32, #tpu.memory_space<vmem>>, vector<1x8x256xf32>,
    return
  }
  func.func @transform_0(%arg0: i32) -> (i32, i32, i32) {
    %c0_i32 = arith.constant 0 : i32
    %c0_i32_0 = arith.constant 0 : i32
    %c0_i32_1 = arith.constant 0 : i32
    return %arg0, %c0_i32, %c0_i32_0 : i32, i32, i32
  }
  func.func @transform_1(%arg0: i32) -> (i32, i32) {
    %c0_i32 = arith.constant 0 : i32
    %c0_i32_0 = arith.constant 0 : i32
    %c0_i32_1 = arith.constant 0 : i32
    return %c0_i32, %c0_i32_0 : i32, i32
  }
  func.func @transform_2(%arg0: i32) -> (i32, i32) {
    %c0_i32 = arith.constant 0 : i32
    %c0_i32_0 = arith.constant 0 : i32
    %c0_i32_1 = arith.constant 0 : i32
    return %c0_i32, %c0_i32_0 : i32, i32
  }
  func.func @transform_3(%arg0: i32) -> (i32, i32) {
    %c0_i32 = arith.constant 0 : i32
    %c0_i32_0 = arith.constant 0 : i32
    %c0_i32_1 = arith.constant 0 : i32
    return %c0_i32, %c0_i32_0 : i32, i32
  }
  func.func @transform_4(%arg0: i32) -> (i32, i32) {
    %c0_i32 = arith.constant 0 : i32
    %c0_i32_0 = arith.constant 0 : i32
    %c0_i32_1 = arith.constant 0 : i32
    return %c0_i32, %c0_i32_0 : i32, i32
  }
  func.func @transform_5(%arg0: i32) -> (i32, i32) {
    %c0_i32 = arith.constant 0 : i32
    %c0_i32_0 = arith.constant 0 : i32
    %c0_i32_1 = arith.constant 0 : i32
    return %c0_i32, %c0_i32_0 : i32, i32
  }
  func.func @transform_6(%arg0: i32) -> (i32, i32) {
    %c0_i32 = arith.constant 0 : i32
    %c0_i32_0 = arith.constant 0 : i32
    %c0_i32_1 = arith.constant 0 : i32
    return %c0_i32, %c0_i32_0 : i32, i32
  }
  func.func @transform_7(%arg0: i32) -> (i32, i32) {
    %c0_i32 = arith.constant 0 : i32
    %c0_i32_0 = arith.constant 0 : i32
    %c0_i32_1 = arith.constant 0 : i32
    return %c0_i32, %c0_i32_0 : i32, i32
  }
  func.func @transform_8(%arg0: i32) -> (i32, i32, i32) {
    %c0_i32 = arith.constant 0 : i32
    %c0_i32_0 = arith.constant 0 : i32
    %c0_i32_1 = arith.constant 0 : i32
    return %arg0, %c0_i32, %c0_i32_0 : i32, i32, i32
  }
}

</mosaic_0001>

<bundles_post_ra>
// kernel: tpu_custom_call.1
= control target key start
LH: loop header
LB: loop body
LE: loop exit
PB: predicated region body
PF: predicated region fallthrough
CT: control target
= control target key end

     0   :  { %13 = vsyncpa [#allocation4], 0  ;;  %s1987_s0 = inlined_call_operand.vmem [shape: f32[2,8,256], index: 0, kind: input, shape index: {}]   ;;  %s1988_s1 = inlined_call_operand.vmem [shape: f32[8,8], index: 1, kind: input, shape index: {}]   ;;  %s1989_s2 = inlined_call_operand.vmem [shape: f32[8,1], index: 2, kind: input, shape index: {}]   ;;  %s1990_s3 = inlined_call_operand.vmem [shape: f32[72,8], index: 3, kind: input, shape index: {}]   ;;  %s1991_s4 = inlined_call_operand.vmem [shape: f32[8,1], index: 4, kind: input, shape index: {}]   ;;  %s1992_s5 = inlined_call_operand.vmem [shape: f32[8,8], index: 5, kind: input, shape index: {}]   ;;  %s1993_s6 = inlined_call_operand.vmem [shape: f32[8,1], index: 6, kind: input, shape index: {}]   ;;  %s1994_s7 = inlined_call_operand.vmem [shape: f32[2,256], index: 7, kind: input, shape index: {}]   ;;  %s1995_s8 = inlined_call_operand.hbm [shape: f32[2,8,256], index: 8, kind: output, shape index: {}]  }
   0x1   :  { %15 = vsyncpa [#allocation4 + $0x1], 0  ;;  %s1748_s27 = smov 0   ;;  %s1750_s28 = smov 0  }
   0x2   :  { %s1752_s29 = smov 0   ;;  %s1754_s30 = smov 0  }
   0x3 LB: > { %s1769_s9 = sadd.s32 4294967295, %s1690_s30   ;;  %s1512_s10 = sadd.s32 4294967294, %s1690_s30   ;;  %s1690_s30 = sphi %s1754_s30, %s2001_s30   ;;  %s1686_s29 = sphi %s1752_s29, %s2000_s29   ;;  %s1682_s28 = sphi %s1750_s28, %s1999_s28   ;;  %s1678_s27 = sphi %s1748_s27, %s1998_s27  }
   0x4   : > { %s1773_s11 = sadd.s32 1, %s1690_s30   ;;  %s201_s12 = sadd.s32 1, %s1686_s29 }
   0x5   : > { %s198_s13 = ssub.s32 %s1690_s30, %s1773_s11  ;;  %p211_p0 = scmp.ne.s32.totalorder %s1686_s29, %s1682_s28 }
   0x6   : > { %p199_p1 = scmp.eq.s32.totalorder %s198_s13, 0  ;;  %p212_p2 = scmp.eq.s32.totalorder %s1769_s9, 1 }
   0x7   : > { %p217_p3 = scmp.ne.s32.totalorder %s1682_s28, %s1678_s27  ;;  %p218_p4 = scmp.eq.s32.totalorder %s1512_s10, 1 }
   0x8   : > { %s1784_s14 = scalar_select %p199_p1, %s1686_s29, %s201_s12  }
   0x9   : > { %p1786_p5 = por %p212_p2, %p211_p0  ;;  %p1790_p6 = por %p218_p4, %p217_p3 }
   0xa   : > { %p1515_p7 = scmp.ge.s32.totalorder %s1690_s30, 1  ;;  %p265_p8 = scmp.lt.s32.totalorder %s1690_s30, 3 }
   0xc   : > { %p266_p9 = pnand %p1515_p7, %p265_p8 }
   0xd   : > { %p299_p10 = scmp.lt.s32.totalorder (!%p266_p9), %s1769_s9, 1  ;;  %v308_v0 = vld [vmem:[%s1989_s2] sm:$0xff] (!%p266_p9)  ;;  %v424_v1 = vlaneseq (!%p266_p9)  ;;  %v1692_v2 = vmov (!%p266_p9), 0.0   ;;  %v1693_v3 = vmov (!%p266_p9), 0   ;;  %vm314_vm0 = vcmask (!%p266_p9), 64512   ;;  %s1694_s12 = smov (!%p266_p9), 127  }
   0xe   : > { %269 = sbr.rel (%p266_p9) target bundleno = 944 (0x3b0), region = 52  ;;  %382 = vmatprep.mubr.f32.mxu0 (!%p266_p9), %v1692_v2  ;;  %1602 = vset.pattern.permute.xlu0 (!%p266_p9), %v1693_v3  ;;  %v304_v5 = vld [vmem:[%s1994_s7] sm:$0xf] (!%p266_p9)  ;;  %s1695_s13 = smov (!%p266_p9), 1   ;;  %vm758_vm1 = vcmask (!%p266_p9), 1039360   ;;  %vm775_vm2 = vcmask (!%p266_p9), 7168  }
   0xf   : > { %311 = vperm.xlu0 (!%p266_p9), %1602, %v308_v0   ;;  %v425_v4 = vshrl.u32 (!%p266_p9), %v424_v1, 7  ;;  %847 = vmatprep.mubr.f32.mxu1 (!%p266_p9), %v1692_v2  ;;  %v307_v12 = vld [vmem:[%s1988_s1] sm:$0xff] (!%p266_p9)  ;;  %s1696_s17 = smov (!%p266_p9), 15   ;;  %s1697_s18 = smov (!%p266_p9), 111   ;;  %vm448_vm3 = vcmask (!%p266_p9), 908288   ;;  %vm673_vm4 = vcmask (!%p266_p9), 121856  }
  0x10   : > { %1603 = vset.pattern.permute.xlu1 (!%p266_p9), %v1693_v3  ;;  %s1699_s20 = smov (!%p266_p9), 17   ;;  %s1700_s21 = smov (!%p266_p9), 16   ;;  %vm656_vm5 = vcmask (!%p266_p9), 924672   ;;  %vm553_vm6 = vcmask (!%p266_p9), 138240   ;;  %vm465_vm7 = vcmask (!%p266_p9), 130048   ;;  %vm1139_vm8 = vcmask (!%p266_p9), 916480  }
  0x11   : > { %v426_v6 = vsub.s32 (!%p266_p9), 0, %v425_v4  ;;  %v430_v7 = vsub.s32 (!%p266_p9), 2, %v425_v4  ;;  %v634_v8 = vsub.s32 (!%p266_p9), 1, %v425_v4  ;;  %v638_v9 = vsub.s32 (!%p266_p9), 3, %v425_v4  ;;  %s1536_s23 = sshll.u32 (!%p266_p9), %s1769_s9, 8 }
  0x13   : > { %v431_v13 = vrot.slane (!%p266_p9), %v304_v5, %v430_v7  ;;  %v427_v14 = vrot.slane (!%p266_p9), %v304_v5, %v426_v6  ;;  %v635_v15 = vrot.slane (!%p266_p9), %v304_v5, %v634_v8  ;;  %v639_v16 = vrot.slane (!%p266_p9), %v304_v5, %v638_v9 }
  0x15   : > { %s300_s19 = scalar_select %p299_p10, %s1769_s9, 1  ;;  %v441_v17 = vrot.slane %v431_v13, %v426_v6  ;;  %v437_v18 = vrot.slane %v427_v14, %v426_v6  ;;  %v645_v19 = vrot.slane %v635_v15, %v634_v8  ;;  %v649_v20 = vrot.slane %v639_v16, %v634_v8 }
  0x17   : > { %s1535_s22 = sshll.u32 %s300_s19, 4  ;;  %756 = vrot.lane.b32.xlu1 %v441_v17, %s1694_s12  ;;  %754 = vrot.lane.b32.xlu0 %v437_v18, %s1694_s12  ;;  %s1698_s19 = smov 113  }
  0x18   : > { %s303_s25 = scalar_lea.vmem %s1987_s0, %s1535_s22  ;;  %s1701_s22 = smov 112  }
  0x19   : > { %v306_v10 = vld [vmem:[%s303_s25 + $0x8] sm:$0xff]  ;;  %v305_v11 = vld [vmem:[%s303_s25] sm:$0xff] }
  0x1a   : > { %318 = vmatprep.subr.mxu0 %v306_v10 }
  0x1b   : > { %319 = vmatpush1.msra.mxu0 %v305_v11  ;;  %932 = vrot.lane.b32.xlu1 %v645_v19, %s1695_s13  ;;  %v1342_v11 = vld [vmem:[%s1993_s6] sm:$0xff] }
  0x1c   : > { %1519 = vmatmul.mubr.msk.f32.vlgmr.msra.gmra.mrb[0].mxu0 %vm314_vm0, %v307_v12  ;;  %934 = vrot.lane.b32.xlu0 %v649_v20, %s1695_s13  ;;  %v412_v12 = vld [vmem:[%s1991_s4] sm:$0xff] }
  0x1d   : > { %537 = vmatprep.mubr.f32.mxu0 %v1692_v2 }
  0x1f   : > { %1032 = vrot.lane.b32.xlu1 %v437_v18, %s1696_s17 }
  0x20   : > { %1034 = vrot.lane.b32.xlu0 %v441_v17, %s1696_s17 }
  0x23   : > { %444 = vrot.lane.b32.xlu1 %v437_v18, %s1697_s18 }
  0x24   : > { %446 = vrot.lane.b32.xlu0 %v441_v17, %s1697_s18  ;;  %v406_v17 = vld [vmem:[%s1990_s3 + $0x18] sm:$0xff] }
  0x27   : > { %652 = vrot.lane.b32.xlu1 %v645_v19, %s1698_s19 }
  0x28   : > { %654 = vrot.lane.b32.xlu0 %v649_v20, %s1698_s19 }
  0x2b   : > { %1220 = vrot.lane.b32.xlu1 %v645_v19, %s1699_s20 }
  0x2c   : > { %1222 = vrot.lane.b32.xlu0 %v649_v20, %s1699_s20 }
  0x89   : > { %v757_v34 = vpop.permute.xlu1 %756 }
  0x8d   : > { %v933_v44 = vpop.permute.xlu1 %932 }
  0x8e   : > { %v312_v21 = vpop.permute.xlu0 %311 }
  0x91   : > { %v1033_v48 = vpop.permute.xlu1 %1032 }
  0x92   : > { %v755_v35 = vpop.permute.xlu0 %754 }
  0x93   : > { %v759_v37 = vsel %vm758_vm1, %v755_v35, %v757_v34  ;;  %v763_v43 = vmul.f32 0.0, %v755_v35 }
  0x95   : > { %v445_v52 = vpop.permute.xlu1 %444 }
  0x96   : > { %v935_v45 = vpop.permute.xlu0 %934  ;;  %v453_v62 = vmul.f32 0.0, %v445_v52 }
  0x97   : > { %v942_v47 = vmul.f32 0.0, %v935_v45  ;;  %v936_v51 = vsel %vm775_vm2, %v933_v44, %v935_v45 }
  0x99   : > { %v653_v60 = vpop.permute.xlu1 %652 }
  0x9a   : > { %v1035_v49 = vpop.permute.xlu0 %1034  ;;  %v661_v9 = vmul.f32 0.0, %v653_v60 }
  0x9b   : > { %v1042_v50 = vmul.f32 0.0, %v1035_v49  ;;  %v1036_v58 = vsel %vm673_vm4, %v1033_v48, %v1035_v49 }
  0x9d   : > { %v1221_v1 = vpop.permute.xlu1 %1220 }
  0x9e   : > { %v447_v53 = vpop.permute.xlu0 %446 }
  0x9f   : > { %v449_v55 = vsel %vm448_vm3, %v445_v52, %v447_v53 }
  0xa2   : > { %v655_v61 = vpop.permute.xlu0 %654 }
  0xa3   : > { %v657_v0 = vsel %vm656_vm5, %v653_v60, %v655_v61  ;;  %v411_v60 = vld [vmem:[%s1990_s3 + $0x40] sm:$0xff] }
  0xa6   : > { %v1223_v3 = vpop.permute.xlu0 %1222 }
  0xa7   : > { %v1230_v4 = vmul.f32 0.0, %v1223_v3  ;;  %v1224_v6 = vsel %vm553_vm6, %v1221_v1, %v1223_v3 }
  0xef   : > { %v384_v22 = vpop.f32.mrb[0].mxu0 }
  0xf0   : > { %v385_v23 = vadd.f32 %v384_v22, %v312_v21  ;;  %v386_v24 = vpop.f32.mrb[1].mxu0 }
  0xf1   : > { %v387_v25 = vadd.f32 %v386_v24, %v312_v21 }
  0xf2   : > { %v389_v26 = vsub.f32 0.0, %v385_v23 }
  0xf3   : > { %v390_v27 = vsub.f32 0.0, %v387_v25 }
  0xf4   : > { %v391_v28 = vmul.f32 1.442695, %v389_v26 }
  0xf5   : > { %v393_v29 = vmul.f32 1.442695, %v390_v27  ;;  %v404_v27 = vld [vmem:[%s1990_s3 + $0x8] sm:$0xff] }
  0xf6   : > { %1604 = vpow2.f32 %v391_v28 }
  0xf7   : > { %1606 = vpow2.f32 %v393_v29 }
 0x100   : > { %v1605_v30 = vpop.eup %1604 }
 0x101   : > { %v1607_v31 = vpop.eup %1606  ;;  %v395_v32 = vadd.f32 1.0, %v1605_v30 }
 0x102   : > { %v396_v33 = vadd.f32 1.0, %v1607_v31 }
 0x103   : > { %1608 = vrcp.f32 %v395_v32 }
 0x104   : > { %1610 = vrcp.f32 %v396_v33  ;;  %v408_v33 = vld [vmem:[%s1990_s3 + $0x28] sm:$0xff] }
 0x10d   : > { %v1609_v36 = vpop.eup %1608 }
 0x10e   : > { %v1611_v38 = vpop.eup %1610  ;;  %v1827_v39 = vmul.f32 %v1609_v36, %v385_v23  ;;  %v407_v23 = vld [vmem:[%s1990_s3 + $0x20] sm:$0xff] }
 0x10f   : > { %v1829_v40 = vmul.f32 %v1611_v38, %v387_v25 }
 0x110   : > { %v764_v41 = vmul.f32 %v759_v37, %v1827_v39  ;;  %v940_v46 = vmul.f32 %v933_v44, %v1827_v39  ;;  %v454_v56 = vmul.f32 %v449_v55, %v1827_v39  ;;  %v1040_v57 = vmul.f32 %v1033_v48, %v1827_v39 }
 0x111   : > { %v765_v42 = vmul.f32 %v757_v34, %v1829_v40  ;;  %v941_v54 = vmul.f32 %v936_v51, %v1829_v40  ;;  %v1041_v59 = vmul.f32 %v1036_v58, %v1829_v40  ;;  %v455_v63 = vmul.f32 %v447_v53, %v1829_v40 }
 0x112   : > { %771 = vrot.lane.b32.xlu1 %v764_v41, %s1695_s13  ;;  %v662_v5 = vmul.f32 %v657_v0, %v1827_v39  ;;  %v1229_v7 = vmul.f32 %v1224_v6, %v1829_v40  ;;  %v663_v8 = vmul.f32 %v655_v61, %v1829_v40  ;;  %v1228_v10 = vmul.f32 %v1221_v1, %v1827_v39 }
 0x113   : > { %773 = vrot.lane.b32.xlu0 %v765_v42, %s1695_s13 }
 0x116   : > { %769 = vrot.lane.b32.xlu1 %v763_v43, %s1695_s13 }
 0x117   : > { %946 = vrot.lane.b32.xlu0 %v940_v46, %s1694_s12 }
 0x11a   : > { %950 = vrot.lane.b32.xlu1 %v942_v47, %s1694_s12  ;;  %v403_v47 = vld [vmem:[%s1990_s3] sm:$0xff] }
 0x11b   : > { %463 = vrot.lane.b32.xlu0 %v1829_v40, %s1700_s21 }
 0x11e   : > { %461 = vrot.lane.b32.xlu1 %v1827_v39, %s1700_s21 }
 0x11f   : > { %1050 = vrot.lane.b32.xlu0 %v1042_v50, %s1698_s19  ;;  %v410_v50 = vld [vmem:[%s1990_s3 + $0x38] sm:$0xff] }
 0x122   : > { %459 = vrot.lane.b32.xlu1 %v1692_v2, %s1700_s21  ;;  %s296_s21 = sand.u32 1, %s1682_s28  }
 0x123   : > { %948 = vrot.lane.b32.xlu0 %v941_v54, %s1694_s12  ;;  %s1945_s12 = scalar_lea.hbm %s1995_s8, %s1536_s23  ;;  %s1439_s13 = scalar_lea.sflag [#allocation4], %s296_s21 }
 0x126   : > { %549 = vrot.lane.b32.xlu1 %v454_v56, %s1699_s20 }
 0x127   : > { %1046 = vrot.lane.b32.xlu0 %v1040_v57, %s1698_s19  ;;  %v405_v57 = vld [vmem:[%s1990_s3 + $0x10] sm:$0xff] }
 0x12a   : > { %1048 = vrot.lane.b32.xlu1 %v1041_v59, %s1698_s19 }
 0x12b   : > { %1137 = vrot.lane.b32.xlu0 %v1692_v2, %s1701_s22 }
 0x12e   : > { %1135 = vrot.lane.b32.xlu1 %v1829_v40, %s1701_s22 }
 0x12f   : > { %1133 = vrot.lane.b32.xlu0 %v1827_v39, %s1701_s22  ;;  %s1516_s22 = sshll.u32 %s296_s21, 4 }
 0x130   : > { %s298_s24 = scalar_lea.vmem [#allocation3], %s1516_s22 }
 0x131   : > { %s1453_s25 = sshll.u32 %s298_s24, 4  ;;  %s1947_s25 = int_to_ptr.vmem [resolvable:$true] %s1453_s25 }
 0x132   : > { %547 = vrot.lane.b32.xlu1 %v453_v62, %s1699_s20  ;;  %s1628_s9 = scalar_lea.vmem %s1947_s25, 256 }
 0x133   : > { %551 = vrot.lane.b32.xlu0 %v455_v63, %s1699_s20  ;;  %p1629_p11 = scmp.ne.s32.totalorder %s1947_s25, %s1628_s9 }
 0x135   : > { %p1630_p12 = pnand %p1629_p11, %p1786_p5 }
 0x136   : > { %669 = vrot.lane.b32.xlu1 %v662_v5, %s1696_s17 }
 0x137   : > { %1238 = vrot.lane.b32.xlu0 %v1230_v4, %s1697_s18  ;;  %p1631_p13 = pneg %p1630_p12 }
 0x13a   : > { %1236 = vrot.lane.b32.xlu1 %v1229_v7, %s1697_s18 }
 0x13b   : > { %671 = vrot.lane.b32.xlu0 %v663_v8, %s1696_s17 }
 0x13e   : > { %667 = vrot.lane.b32.xlu1 %v661_v9, %s1696_s17  ;;  %s1702_s17 = smov [#allocation3]  }
 0x13f   : > { %1234 = vrot.lane.b32.xlu0 %v1228_v10, %s1697_s18  ;;  %s1632_s18 = sshll.u32 %s1702_s17, 4  ;;  %s1633_s18 = int_to_ptr.vmem [resolvable:$false] %s1632_s18 }
 0x140   : > { %s1634_s19 = scalar_lea.vmem %s1633_s18, 512  ;;  %p1635_p0 = scmp.lt.s32.totalorder %s1947_s25, %s1633_s18 }
 0x141   : > { %p1636_p1 = scmp.lt.s32.totalorder %s1634_s19, %s1628_s9 }
 0x142   : > { %1322 = vperm.xlu1 %1603, %v412_v12  }
 0x143   : > { %1345 = vperm.xlu0 %1602, %v1342_v11   ;;  %p1637_p2 = por %p1636_p1, %p1635_p0 }
 0x145   : > { %p1638_p3 = pnand %p1637_p2, %p1631_p13 }
 0x184   : > { %v772_v13 = vpop.permute.xlu1 %771 }
 0x185   : > { %v774_v14 = vpop.permute.xlu0 %773 }
 0x186   : > { %v777_v15 = vsel %vm775_vm2, %v772_v13, %v774_v14 }
 0x187   : > { %783 = vmatprep.subr.mxu1 %v777_v15 }
 0x188   : > { %v770_v16 = vpop.permute.xlu1 %769 }
 0x189   : > { %v947_v18 = vpop.permute.xlu0 %946  ;;  %v776_v19 = vsel %vm775_vm2, %v770_v16, %v772_v13 }
 0x18a   : > { %784 = vmatpush1.msra.mxu1 %v776_v19  ;;  %v1341_v19 = vld [vmem:[%s1992_s5] sm:$0xff] }
 0x18b   : > { %1523 = vmatmul.mubr.msk.f32.vlgmr.msra.gmra.mrb[0].mxu1 %vm314_vm0, %v406_v17  ;;  %859 = vmatprep.subr.mxu1 %v1829_v40  ;;  %v409_v40 = vld [vmem:[%s1990_s3 + $0x30] sm:$0xff] }
 0x18c   : > { %860 = vmatpush1.msra.mxu1 %v1827_v39  ;;  %v951_v20 = vpop.permute.xlu1 %950  ;;  %923 = vmatprep.mubr.f32.mxu1 %v1692_v2 }
 0x18d   : > { %v464_v21 = vpop.permute.xlu0 %463 }
 0x190   : > { %v462_v22 = vpop.permute.xlu1 %461 }
 0x191   : > { %v1051_v24 = vpop.permute.xlu0 %1050  ;;  %v467_v25 = vsel %vm465_vm7, %v462_v22, %v464_v21 }
 0x192   : > { %473 = vmatprep.subr.mxu0 %v467_v25 }
 0x193   : > { %1524 = vmatmul.mubr.msk.f32.vlgmr.msra.gmra.mrb[0].mxu1 %vm314_vm0, %v407_v23 }
 0x194   : > { %v460_v26 = vpop.permute.xlu1 %459  ;;  %1023 = vmatprep.mubr.f32.mxu1 %v1692_v2 }
 0x195   : > { %v466_v28 = vsel %vm465_vm7, %v460_v26, %v462_v22  ;;  %v949_v29 = vpop.permute.xlu0 %948 }
 0x196   : > { %v952_v30 = vsel %vm758_vm1, %v947_v18, %v949_v29  ;;  %474 = vmatpush1.msra.mxu0 %v466_v28  ;;  %v953_v31 = vsel %vm758_vm1, %v949_v29, %v951_v20 }
 0x197   : > { %959 = vmatprep.subr.mxu1 %v953_v31  ;;  %1520 = vmatmul.mubr.msk.f32.vlgmr.msra.gmra.mrb[2].mxu0 %vm314_vm0, %v404_v27 }
 0x198   : > { %960 = vmatpush1.msra.mxu1 %v952_v30  ;;  %v550_v32 = vpop.permute.xlu1 %549  ;;  %625 = vmatprep.mubr.f32.mxu0 %v1692_v2 }
 0x199   : > { %v1047_v34 = vpop.permute.xlu0 %1046 }
 0x19b   : > { %1525 = vmatmul.mubr.msk.f32.vlgmr.msra.gmra.mrb[0].mxu1 %vm314_vm0, %v408_v33 }
 0x19c   : > { %v1049_v35 = vpop.permute.xlu1 %1048  ;;  %1123 = vmatprep.mubr.f32.mxu1 %v1692_v2 }
 0x19d   : > { %v1052_v36 = vsel %vm656_vm5, %v1047_v34, %v1049_v35  ;;  %v1138_v37 = vpop.permute.xlu0 %1137  ;;  %v1053_v38 = vsel %vm656_vm5, %v1049_v35, %v1051_v24 }
 0x19e   : > { %1059 = vmatprep.subr.mxu1 %v1053_v38 }
 0x19f   : > { %1060 = vmatpush1.msra.mxu1 %v1052_v36 }
 0x1a0   : > { %v1136_v39 = vpop.permute.xlu1 %1135 }
 0x1a1   : > { %v1134_v41 = vpop.permute.xlu0 %1133  ;;  %v1141_v42 = vsel %vm1139_vm8, %v1136_v39, %v1138_v37 }
 0x1a2   : > { %v1140_v43 = vsel %vm1139_vm8, %v1134_v41, %v1136_v39  ;;  %1147 = vmatprep.subr.mxu1 %v1141_v42 }
 0x1a3   : > { %1526 = vmatmul.mubr.msk.f32.vlgmr.msra.gmra.mrb[0].mxu1 %vm314_vm0, %v409_v40 }
 0x1a4   : > { %1148 = vmatpush1.msra.mxu1 %v1140_v43  ;;  %v548_v44 = vpop.permute.xlu1 %547  ;;  %1211 = vmatprep.mubr.f32.mxu1 %v1692_v2 }
 0x1a5   : > { %v552_v45 = vpop.permute.xlu0 %551  ;;  %v554_v48 = vsel %vm553_vm6, %v548_v44, %v550_v32 }
 0x1a6   : > { %v555_v46 = vsel %vm553_vm6, %v550_v32, %v552_v45 }
 0x1a7   : > { %561 = vmatprep.subr.mxu0 %v555_v46 }
 0x1a8   : > { %562 = vmatpush1.msra.mxu0 %v554_v48  ;;  %v670_v49 = vpop.permute.xlu1 %669 }
 0x1a9   : > { %v1239_v51 = vpop.permute.xlu0 %1238  ;;  %1521 = vmatmul.mubr.msk.f32.vlgmr.msra.gmra.mrb[2].mxu0 %vm314_vm0, %v403_v47 }
 0x1aa   : > { %745 = vmatprep.mubr.f32.mxu0 %v1692_v2 }
 0x1ab   : > { %1527 = vmatmul.mubr.msk.f32.vlgmr.msra.gmra.mrb[0].mxu1 %vm314_vm0, %v410_v50 }
 0x1ac   : > { %v1237_v52 = vpop.permute.xlu1 %1236  ;;  %1311 = vmatprep.mubr.f32.mxu1 %v1692_v2 }
 0x1ad   : > { %v672_v53 = vpop.permute.xlu0 %671  ;;  %v1241_v54 = vsel %vm448_vm3, %v1237_v52, %v1239_v51 }
 0x1ae   : > { %1247 = vmatprep.subr.mxu1 %v1241_v54  ;;  %v675_v55 = vsel %vm673_vm4, %v670_v49, %v672_v53 }
 0x1af   : > { %681 = vmatprep.subr.mxu0 %v675_v55 }
 0x1b0   : > { %v668_v56 = vpop.permute.xlu1 %667 }
 0x1b1   : > { %v674_v58 = vsel %vm673_vm4, %v668_v56, %v670_v49  ;;  %v1235_v59 = vpop.permute.xlu0 %1234 }
 0x1b2   : > { %v1240_v61 = vsel %vm448_vm3, %v1235_v59, %v1237_v52  ;;  %682 = vmatpush1.msra.mxu0 %v674_v58 }
 0x1b3   : > { %1522 = vmatmul.mubr.msk.f32.vlgmr.msra.gmra.mrb[2].mxu0 %vm314_vm0, %v405_v57  ;;  %1248 = vmatpush1.msra.mxu1 %v1240_v61 }
 0x1b4   : > { %1528 = vmatmul.mubr.msk.f32.vlgmr.msra.gmra.mrb[0].mxu1 %vm314_vm0, %v411_v60  ;;  %1415 = vmatprep.mubr.f32.mxu0 %v1692_v2 }
 0x1c1   : > { %v1323_v63 = vpop.permute.xlu1 %1322 }
 0x1c2   : > { %v1346_v20 = vpop.permute.xlu0 %1345 }
 0x286   : > { %v747_v62 = vpop.f32.mrb[2].mxu0 }
 0x287   : > { %v749_v0 = vpop.f32.mrb[3].mxu0  ;;  %v1313_v1 = vpop.f32.mrb[0].mxu1 }
 0x288   : > { %v1537_v3 = vadd.f32 %v1313_v1, %v747_v62  ;;  %v1315_v4 = vpop.f32.mrb[1].mxu1 }
 0x289   : > { %v1538_v5 = vadd.f32 %v1315_v4, %v749_v0 }
 0x28a   : > { %v1325_v6 = vadd.f32 %v1537_v3, %v1323_v63 }
 0x28b   : > { %v1326_v7 = vadd.f32 %v1538_v5, %v1323_v63 }
 0x28c   : > { %v1327_v8 = vsub.f32 0.0, %v1325_v6 }
 0x28d   : > { %v1328_v9 = vsub.f32 0.0, %v1326_v7 }
 0x28e   : > { %v1329_v10 = vmul.f32 1.442695, %v1327_v8 }
 0x28f   : > { %v1331_v11 = vmul.f32 1.442695, %v1328_v9 }
 0x290   : > { %1612 = vpow2.f32 %v1329_v10 }
 0x291   : > { %1614 = vpow2.f32 %v1331_v11 }
 0x29a   : > { %v1613_v12 = vpop.eup %1612 }
 0x29b   : > { %v1615_v13 = vpop.eup %1614  ;;  %v1333_v14 = vadd.f32 1.0, %v1613_v12 }
 0x29c   : > { %v1334_v15 = vadd.f32 1.0, %v1615_v13 }
 0x29d   : > { %1616 = vrcp.f32 %v1333_v14 }
 0x29e   : > { %1618 = vrcp.f32 %v1334_v15 }
 0x2a7   : > { %v1617_v2 = vpop.eup %1616 }
 0x2a8   : > { %v1619_v16 = vpop.eup %1618  ;;  %v1339_v18 = vmul.f32 %v1617_v2, %v1325_v6 }
 0x2a9   : > { %v1340_v17 = vmul.f32 %v1619_v16, %v1326_v7 }
 0x2ab   : > { %1351 = vmatprep.subr.mxu0 %v1340_v17 }
 0x2ac   : > { %1352 = vmatpush1.msra.mxu0 %v1339_v18 }
 0x2ad   : > { %1529 = vmatmul.mubr.msk.f32.vlgmr.msra.gmra.mrb[4].mxu0 %vm314_vm0, %v1341_v19 }
 0x380   : > { %v1417_v21 = vpop.f32.mrb[4].mxu0 }
 0x381   : > { %v1418_v22 = vadd.f32 %v1417_v21, %v1346_v20  ;;  %v1419_v23 = vpop.f32.mrb[5].mxu0 }
 0x382   : > { %v1420_v24 = vadd.f32 %v1419_v23, %v1346_v20 }
 0x383   : > { %v1422_v25 = vsub.f32 0.0, %v1418_v22 }
 0x384   : > { %v1423_v26 = vsub.f32 0.0, %v1420_v24 }
 0x385   : > { %v1424_v27 = vmul.f32 1.442695, %v1422_v25 }
 0x386   : > { %v1426_v28 = vmul.f32 1.442695, %v1423_v26 }
 0x387   : > { %1620 = vpow2.f32 %v1424_v27 }
 0x388   : > { %1622 = vpow2.f32 %v1426_v28 }
 0x391   : > { %v1621_v29 = vpop.eup %1620 }
 0x392   : > { %v1623_v30 = vpop.eup %1622  ;;  %v1428_v31 = vadd.f32 1.0, %v1621_v29 }
 0x393   : > { %v1429_v32 = vadd.f32 1.0, %v1623_v30 }
 0x394   : > { %1624 = vrcp.f32 %v1428_v31 }
 0x395   : > { %1626 = vrcp.f32 %v1429_v32 }
 0x39e   : > { %v1625_v33 = vpop.eup %1624 }
 0x39f   : > { %v1627_v34 = vpop.eup %1626  ;;  %v1434_v35 = vmul.f32 %v1625_v33, %v1418_v22 }
 0x3a0   : > { %v1435_v36 = vmul.f32 %v1627_v34, %v1420_v24 }
 0x3a1   : > { %1436 = vst [vmem:[%s298_s24] sm:$0xff] %v1434_v35 }
 0x3a2   : > { %1437 = vst [vmem:[%s298_s24 + $0x8] sm:$0xff] %v1435_v36 }
 0x3a3   : > { %1641 = shalt.err (!%p1638_p3)
}
 0x3a4   : > { %s1642_s20 = scalar_lea.hbm %s1945_s12, 256  ;;  %s1646_s23 = scalar_lea.hbm %s1995_s8, 512 }
 0x3a5   : > { %p1643_p4 = scmp.ne.s32.totalorder %s1945_s12, %s1642_s20  ;;  %p1647_p9 = scmp.lt.u32.totalorder %s1945_s12, %s1995_s8 }
 0x3a6   : > { %p1648_p10 = scmp.lt.u32.totalorder %s1646_s23, %s1642_s20  ;;  %p1650_p12 = scmp.lt.u32.totalorder %s1642_s20, %s1945_s12 }
 0x3a7   : > { %p1644_p7 = pnand %p1643_p4, %p1786_p5 }
 0x3a8   : > { %p1649_p11 = por %p1648_p10, %p1647_p9 }
 0x3a9   : > { %p1645_p8 = pneg %p1644_p7 }
 0x3aa   : > { %p1651_p13 = por %p1650_p12, %p1649_p11 }
 0x3ac   : > { %p1652_p0 = pnand %p1651_p13, %p1645_p8 }
 0x3ae   : > { %1655 = shalt.err (!%p1652_p0)
}
 0x3af   : > { %1553 = dma.vmem_to_hbm [thread:$0]  (%p1786_p5), %s1947_s25, 256, %s1945_s12, %s1439_s13  }
 0x3b0 PF: > { %p1559_p1 = scmp.ge.s32.totalorder %s1690_s30, 2  ;;  %s1465_s10 = sand.u32 1, %s1678_s27  }
 0x3b1   : > { %s1466_s9 = scalar_lea.sflag [#allocation4], %s1465_s10 }
 0x3b2   : > { %p1556_p2 = pnand %p1559_p1, %p1790_p6 }
 0x3b4   : > { %1673 = dma.done.wait (!%p1556_p2), %s1466_s9, 256  }
 0x3b5   : > { %1675 = vsyncadd (!%p1556_p2), %s1466_s9, 4294967040  ;;  %p18_p3 = scmp.ge.s32.totalorder %s1773_s11, 4   ;;  %s1998_s27 = smov %s1682_s28 }
 0x3b6   : > { %s1999_s28 = smov %s1686_s29  ;;  %s2000_s29 = smov %s1784_s14 }
 0x3b7   : > { %s2001_s30 = smov %s1773_s11  ;;  %20 = sbr.rel (!%p18_p3) target bundleno = 3 (0x3), region = 87 }
 0x3be   :  { %1471 = vsyncpa [#allocation4], 1 }
 0x3bf   :  { %1473 = vsyncpa [#allocation4 + $0x1], 1 }

</bundles_post_ra>
